<compile_context>
chip_gen: v7x
topology: tpu7x:2x2x1
jax: 0.10.0
libtpu: 0.0.40
codegen_flags: <defaults>
</compile_context>

<pallas_src>
import functools

import numpy as np
import jax
import jax.numpy as jnp
from jax.experimental import pallas as pl
from jax.experimental.pallas import tpu as pltpu


# ----------------------------- in-kernel helpers --------------------------- #

def _lane_shift(y, off):
    """Return z with z[:, p] = y[:, p + off], zero-filled outside [0, P)."""
    if off == 0:
        return y
    c, p = y.shape
    pad = jnp.zeros((c, abs(off)), y.dtype)
    if off > 0:
        return jnp.concatenate([y[:, off:], pad], axis=1)
    return jnp.concatenate([pad, y[:, :p + off]], axis=1)


# --------------------------------- kernel ---------------------------------- #

def _basic_block_kernel(*refs, wo, has_proj):
    """Fully fused BasicBlock forward for one image.

    Layout: channels on sublanes, flattened output pixels P = Ho*Wo on lanes.
    BN scales are pre-folded into the (bf16) weights; only the bias is added here.

    refs (has_proj=True):
      taps1 (1,K1,P) bf16 | w1 (Cout,K1) bf16 | b1 (Cout,1) f32 |
      tapsd (1,Cin,P) bf16 | wd (Cout,Cin) bf16 | bd (Cout,1) f32 |
      w2 (Cout,K2) bf16 | b2 (Cout,1) f32 | mask2 (9,P) f32 | o (1,Cout,P) f32
    refs (has_proj=False): the tapsd/wd/bd triple is replaced by res (1,Cout,P) f32.
    """
    if has_proj:
        (taps1_ref, w1_ref, b1_ref, tapsd_ref, wd_ref, bd_ref,
         w2_ref, b2_ref, mask_ref, o_ref) = refs
    else:
        (taps1_ref, w1_ref, b1_ref, res_ref,
         w2_ref, b2_ref, mask_ref, o_ref) = refs

    # conv1 + bn1 + relu : single concatenated-K matmul (Cout,K1)@(K1,P) -> (Cout,P)
    y = jnp.dot(w1_ref[...], taps1_ref[0], preferred_element_type=jnp.float32)
    y = jnp.maximum(y + b1_ref[...], 0.0)

    # shortcut branch (1x1 projection conv + bn, or identity)
    if has_proj:
        r = jnp.dot(wd_ref[...], tapsd_ref[0],
                    preferred_element_type=jnp.float32) + bd_ref[...]
    else:
        r = res_ref[0]

    # conv2 taps built in-kernel (3x3, stride 1, pad 1): static lane shifts of the
    # VMEM-resident y plus precomputed boundary-validity masks.
    mask = mask_ref[...]                                   # (9, P) f32
    taps2 = []
    t = 0
    for dy in (-1, 0, 1):
        for dx in (-1, 0, 1):
            shifted = _lane_shift(y, dy * wo + dx)         # (Cout, P)
            taps2.append(shifted * mask[t:t + 1])
            t += 1
    taps2 = jnp.concatenate(taps2, axis=0).astype(jnp.bfloat16)   # (K2, P)

    # conv2 + bn2 + residual add + relu
    y2 = jnp.dot(w2_ref[...], taps2, preferred_element_type=jnp.float32) + b2_ref[...]
    o_ref[0] = jnp.maximum(y2 + r, 0.0)


# ------------------------------ wrapper glue -------------------------------- #

def _im2col_cp(x_nchw, k, stride):
    """Extract k*k conv taps; returns (N, k*k*C, Ho*Wo), pixels flattened on last dim."""
    n, c, h, w = x_nchw.shape
    pad = (k - 1) // 2
    xp = jnp.pad(x_nchw, ((0, 0), (0, 0), (pad, pad), (pad, pad)))
    ho = (h + 2 * pad - k) // stride + 1
    wo = (w + 2 * pad - k) // stride + 1
    taps = []
    for ky in range(k):
        for kx in range(k):
            taps.append(jax.lax.slice(
                xp, (0, 0, ky, kx),
                (n, c, ky + (ho - 1) * stride + 1, kx + (wo - 1) * stride + 1),
                (1, 1, stride, stride)))                    # (N, C, Ho, Wo)
    taps = jnp.stack(taps, axis=1)                          # (N, T, C, Ho, Wo)
    return taps.reshape(n, k * k * c, ho * wo), ho, wo


def _conv2_masks(ho, wo):
    """Validity masks for the 9 in-kernel tap shifts of a 3x3 / stride-1 / pad-1 conv."""
    oy, ox = np.meshgrid(np.arange(ho), np.arange(wo), indexing="ij")
    rows = []
    for dy in (-1, 0, 1):
        for dx in (-1, 0, 1):
            valid = ((oy + dy >= 0) & (oy + dy < ho) &
                     (ox + dx >= 0) & (ox + dx < wo))
            rows.append(valid.reshape(-1))
    return jnp.asarray(np.stack(rows, 0), dtype=np.float32)  # (9, Ho*Wo)


def _fold_weight(w_hwio, scale):
    """(k,k,Cin,Cout) HWIO weights * per-Cout BN scale -> (Cout, k*k*Cin) bf16."""
    k, _, cin, cout = w_hwio.shape
    w = (w_hwio.astype(jnp.float32) * scale[None, None, None, :]).reshape(k * k * cin, cout)
    return jnp.transpose(w, (1, 0)).astype(jnp.bfloat16)


def basic_block_forward(x_nchw, params, is_downsample):
    """Pallas implementation of BasicBlock.forward (NCHW in, NCHW out)."""
    n, c_in, _, _ = x_nchw.shape
    c_out = params["w1"].shape[3]
    stride = 2 if is_downsample else 1
    has_proj = "wd" in params

    taps1, ho, wo = _im2col_cp(x_nchw, 3, stride)            # (N, 9*Cin, P)
    p = ho * wo
    k1 = 9 * c_in
    k2 = 9 * c_out

    w1 = _fold_weight(params["w1"], params["s1"])            # (Cout, 9*Cin) bf16
    b1 = params["b1"].reshape(c_out, 1).astype(jnp.float32)
    w2 = _fold_weight(params["w2"], params["s2"])            # (Cout, 9*Cout) bf16
    b2 = params["b2"].reshape(c_out, 1).astype(jnp.float32)
    mask2 = _conv2_masks(ho, wo)                             # (9, P) f32

    args = [taps1.astype(jnp.bfloat16), w1, b1]
    in_specs = [
        pl.BlockSpec((1, k1, p), lambda i: (i, 0, 0)),
        pl.BlockSpec((c_out, k1), lambda i: (0, 0)),
        pl.BlockSpec((c_out, 1), lambda i: (0, 0)),
    ]
    if has_proj:
        tapsd, _, _ = _im2col_cp(x_nchw, 1, stride)          # (N, Cin, P)
        wd = _fold_weight(params["wd"], params["sd"])        # (Cout, Cin) bf16
        bd = params["bd"].reshape(c_out, 1).astype(jnp.float32)
        args += [tapsd.astype(jnp.bfloat16), wd, bd]
        in_specs += [
            pl.BlockSpec((1, c_in, p), lambda i: (i, 0, 0)),
            pl.BlockSpec((c_out, c_in), lambda i: (0, 0)),
            pl.BlockSpec((c_out, 1), lambda i: (0, 0)),
        ]
    else:
        res = x_nchw.reshape(n, c_in, p).astype(jnp.float32)  # identity shortcut
        args.append(res)
        in_specs.append(pl.BlockSpec((1, c_out, p), lambda i: (i, 0, 0)))

    args += [w2, b2, mask2]
    in_specs += [
        pl.BlockSpec((c_out, k2), lambda i: (0, 0)),
        pl.BlockSpec((c_out, 1), lambda i: (0, 0)),
        pl.BlockSpec((9, p), lambda i: (0, 0)),
    ]

    kernel = functools.partial(_basic_block_kernel, wo=wo, has_proj=has_proj)

    flops = 2 * n * p * c_out * (k1 + k2 + (c_in if has_proj else 0))
    bytes_accessed = int(sum(int(np.prod(a.shape)) * a.dtype.itemsize for a in args)
                         + n * c_out * p * 4)

    out = pl.pallas_call(
        kernel,
        out_shape=jax.ShapeDtypeStruct((n, c_out, p), jnp.float32),
        grid=(n,),
        in_specs=in_specs,
        out_specs=pl.BlockSpec((1, c_out, p), lambda i: (i, 0, 0)),
        compiler_params=pltpu.CompilerParams(
            dimension_semantics=("parallel",)),
        cost_estimate=pl.CostEstimate(
            flops=int(flops), transcendentals=0, bytes_accessed=bytes_accessed),
    )(*args)
    return out.reshape(n, c_out, ho, wo)


# -------------------------- BasicBlock parameters --------------------------- #

def _fold_bn(gamma, beta, mean, var, eps=1e-5):
    scale = gamma / jnp.sqrt(var + eps)
    return scale, beta - mean * scale


def init_basic_block_params(key, c_in, c_out, is_downsample):
    keys = jax.random.split(key, 15)

    def bn_params(k0, k1, k2, k3, c):
        gamma = 1.0 + 0.1 * jax.random.normal(k0, (c,), jnp.float32)
        beta = 0.1 * jax.random.normal(k1, (c,), jnp.float32)
        mean = 0.1 * jax.random.normal(k2, (c,), jnp.float32)
        var = 0.5 + jnp.abs(jax.random.normal(k3, (c,), jnp.float32))
        return _fold_bn(gamma, beta, mean, var)

    params = {}
    params["w1"] = 0.2 * jax.random.normal(keys[0], (3, 3, c_in, c_out), jnp.float32)
    params["s1"], params["b1"] = bn_params(keys[1], keys[2], keys[3], keys[4], c_out)
    params["w2"] = 0.2 * jax.random.normal(keys[5], (3, 3, c_out, c_out), jnp.float32)
    params["s2"], params["b2"] = bn_params(keys[6], keys[7], keys[8], keys[9], c_out)
    if is_downsample or c_in != c_out:
        params["wd"] = 0.2 * jax.random.normal(keys[10], (1, 1, c_in, c_out), jnp.float32)
        params["sd"], params["bd"] = bn_params(keys[11], keys[12], keys[13], keys[14], c_out)
    return params


# --------------------------- pure-JAX reference ------------------------------ #

def reference_forward(x_nchw, params, is_downsample):
    stride = 2 if is_downsample else 1

    def conv(inp, w, s):
        pad = (w.shape[0] - 1) // 2
        return jax.lax.conv_general_dilated(
            inp, w, (s, s), padding=[(pad, pad), (pad, pad)],
            dimension_numbers=("NCHW", "HWIO", "NCHW"))

    def bn(v, s, b):
        return v * s[None, :, None, None] + b[None, :, None, None]

    y = jnp.maximum(bn(conv(x_nchw, params["w1"], stride),
                       params["s1"], params["b1"]), 0.0)
    y = bn(conv(y, params["w2"], 1), params["s2"], params["b2"])
    if "wd" in params:
        r = bn(conv(x_nchw, params["wd"], stride), params["sd"], params["bd"])
    else:
        r = x_nchw
    return jnp.maximum(y + r, 0.0)


# ----------------------------------- main ------------------------------------ #

if __name__ == "__main__":
    root = jax.random.PRNGKey(0)
    n, h, w_sp = 2, 16, 16
    # (c_in, c_out, is_downsample): identity shortcut, 1x1 projection, strided downsample
    configs = [(4, 4, False), (4, 8, False), (4, 8, True)]

    for idx, (c_in, c_out, is_ds) in enumerate(configs):
        kx, kp = jax.random.split(jax.random.fold_in(root, idx))
        x = jax.random.normal(kx, (n, c_in, h, w_sp), jnp.float32)
        params = init_basic_block_params(kp, c_in, c_out, is_ds)

        out = jax.block_until_ready(basic_block_forward(x, params, is_ds))
        ref = jax.block_until_ready(reference_forward(x, params, is_ds))

        assert out.shape == ref.shape, (out.shape, ref.shape)
        out_np = np.asarray(out)
        ref_np = np.asarray(ref)
        ref_scale = float(np.max(np.abs(ref_np))) + 1e-6
        max_err = float(np.max(np.abs(out_np - ref_np)))
        mean_err = float(np.mean(np.abs(out_np - ref_np)))
        # bf16 MXU operands with f32 accumulation: allow a few % of the output range.
        if max_err > 0.03 * ref_scale or mean_err > 0.01 * ref_scale:
            raise AssertionError(
                f"mismatch for config {(c_in, c_out, is_ds)}: "
                f"max abs err {max_err}, mean abs err {mean_err}, ref scale {ref_scale}")

    print("KERNEL_OK")
</pallas_src>

<mosaic_0001>
module attributes {stable_mosaic.version = 11 : i64} {
  func.func @_basic_block_kernel(%arg0: i32, %arg1: memref<1x36x256xbf16, #tpu.memory_space<vmem>>, %arg2: memref<4x36xbf16, #tpu.memory_space<vmem>>, %arg3: memref<4x1xf32, #tpu.memory_space<vmem>>, %arg4: memref<1x4x256xf32, #tpu.memory_space<vmem>>, %arg5: memref<4x36xbf16, #tpu.memory_space<vmem>>, %arg6: memref<4x1xf32, #tpu.memory_space<vmem>>, %arg7: memref<9x256xf32, #tpu.memory_space<vmem>>, %arg8: memref<1x4x256xf32, #tpu.memory_space<vmem>>) attributes {dimension_semantics = [#tpu.dimension_semantics<parallel>], iteration_bounds = array<i64: 2>, scalar_prefetch = 0 : i64, scratch_operands = 0 : i64, tpu.core_type = #tpu.core_type<tc>, window_params = [{transform_indices = @transform_0, window_bounds = array<i64: 1, 36, 256>}, {pipeline_mode = #tpu.pipeline_mode<synchronous>, transform_indices = @transform_1, window_bounds = array<i64: 4, 36>}, {pipeline_mode = #tpu.pipeline_mode<synchronous>, transform_indices = @transform_2, window_bounds = array<i64: 4, 1>}, {transform_indices = @transform_3, window_bounds = array<i64: 1, 4, 256>}, {pipeline_mode = #tpu.pipeline_mode<synchronous>, transform_indices = @transform_4, window_bounds = array<i64: 4, 36>}, {pipeline_mode = #tpu.pipeline_mode<synchronous>, transform_indices = @transform_5, window_bounds = array<i64: 4, 1>}, {pipeline_mode = #tpu.pipeline_mode<synchronous>, transform_indices = @transform_6, window_bounds = array<i64: 9, 256>}, {transform_indices = @transform_7, window_bounds = array<i64: 1, 4, 256>}]} {
    %c0 = arith.constant 0 : index
    %c0_0 = arith.constant 0 : index
    %0 = vector.load %arg2[%c0, %c0_0] : memref<4x36xbf16, #tpu.memory_space<vmem>>, vector<4x36xbf16>
    %c0_1 = arith.constant 0 : index
    %c0_2 = arith.constant 0 : index
    %c0_3 = arith.constant 0 : index
    %1 = vector.load %arg1[%c0_1, %c0_2, %c0_3] : memref<1x36x256xbf16, #tpu.memory_space<vmem>>, vector<1x36x256xbf16>
    %2 = vector.shape_cast %1 : vector<1x36x256xbf16> to vector<36x256xbf16>
    %cst = arith.constant dense<0.000000e+00> : vector<4x256xf32>
    %3 = tpu.matmul %0, %2, %cst {dimension_numbers = #tpu.dot_dimension_numbers<[1], [0], [0], [1], [0, 0, 1, 1], [], []>} : vector<4x36xbf16>, vector<36x256xbf16>, vector<4x256xf32> -> vector<4x256xf32>
    %c0_4 = arith.constant 0 : index
    %c0_5 = arith.constant 0 : index
    %4 = vector.load %arg3[%c0_4, %c0_5] : memref<4x1xf32, #tpu.memory_space<vmem>>, vector<4x1xf32>
    %5 = vector.broadcast %4 : vector<4x1xf32> to vector<4x256xf32>
    %6 = arith.addf %3, %5 : vector<4x256xf32>
    %cst_6 = arith.constant 0.000000e+00 : f32
    %7 = vector.broadcast %cst_6 : f32 to vector<4x256xf32>
    %8 = arith.maximumf %6, %7 : vector<4x256xf32>
    %c0_7 = arith.constant 0 : index
    %c0_8 = arith.constant 0 : index
    %c0_9 = arith.constant 0 : index
    %9 = vector.load %arg4[%c0_7, %c0_8, %c0_9] : memref<1x4x256xf32, #tpu.memory_space<vmem>>, vector<1x4x256xf32>
    %10 = vector.shape_cast %9 : vector<1x4x256xf32> to vector<4x256xf32>
    %c0_10 = arith.constant 0 : index
    %c0_11 = arith.constant 0 : index
    %11 = vector.load %arg7[%c0_10, %c0_11] : memref<9x256xf32, #tpu.memory_space<vmem>>, vector<9x256xf32>
    %cst_12 = arith.constant 0.000000e+00 : f32
    %12 = vector.broadcast %cst_12 : f32 to vector<4x17xf32>
    %13 = vector.extract_strided_slice %8 {offsets = [0, 0], sizes = [4, 239], strides = [1, 1]} : vector<4x256xf32> to vector<4x239xf32>
    %14 = tpu.concatenate %12, %13 in 1 : vector<4x17xf32>, vector<4x239xf32> -> vector<4x256xf32>
    %15 = vector.extract_strided_slice %11 {offsets = [0, 0], sizes = [1, 256], strides = [1, 1]} : vector<9x256xf32> to vector<1x256xf32>
    %16 = vector.broadcast %15 : vector<1x256xf32> to vector<4x256xf32>
    %17 = arith.mulf %14, %16 : vector<4x256xf32>
    %cst_13 = arith.constant 0.000000e+00 : f32
    %18 = vector.broadcast %cst_13 : f32 to vector<4x16xf32>
    %19 = vector.extract_strided_slice %8 {offsets = [0, 0], sizes = [4, 240], strides = [1, 1]} : vector<4x256xf32> to vector<4x240xf32>
    %20 = tpu.concatenate %18, %19 in 1 : vector<4x16xf32>, vector<4x240xf32> -> vector<4x256xf32>
    %21 = vector.extract_strided_slice %11 {offsets = [1, 0], sizes = [1, 256], strides = [1, 1]} : vector<9x256xf32> to vector<1x256xf32>
    %22 = vector.broadcast %21 : vector<1x256xf32> to vector<4x256xf32>
    %23 = arith.mulf %20, %22 : vector<4x256xf32>
    %cst_14 = arith.constant 0.000000e+00 : f32
    %24 = vector.broadcast %cst_14 : f32 to vector<4x15xf32>
    %25 = vector.extract_strided_slice %8 {offsets = [0, 0], sizes = [4, 241], strides = [1, 1]} : vector<4x256xf32> to vector<4x241xf32>
    %26 = tpu.concatenate %24, %25 in 1 : vector<4x15xf32>, vector<4x241xf32> -> vector<4x256xf32>
    %27 = vector.extract_strided_slice %11 {offsets = [2, 0], sizes = [1, 256], strides = [1, 1]} : vector<9x256xf32> to vector<1x256xf32>
    %28 = vector.broadcast %27 : vector<1x256xf32> to vector<4x256xf32>
    %29 = arith.mulf %26, %28 : vector<4x256xf32>
    %cst_15 = arith.constant 0.000000e+00 : f32
    %30 = vector.broadcast %cst_15 : f32 to vector<4x1xf32>
    %31 = vector.extract_strided_slice %8 {offsets = [0, 0], sizes = [4, 255], strides = [1, 1]} : vector<4x256xf32> to vector<4x255xf32>
    %32 = tpu.concatenate %30, %31 in 1 : vector<4x1xf32>, vector<4x255xf32> -> vector<4x256xf32>
    %33 = vector.extract_strided_slice %11 {offsets = [3, 0], sizes = [1, 256], strides = [1, 1]} : vector<9x256xf32> to vector<1x256xf32>
    %34 = vector.broadcast %33 : vector<1x256xf32> to vector<4x256xf32>
    %35 = arith.mulf %32, %34 : vector<4x256xf32>
    %36 = vector.extract_strided_slice %11 {offsets = [4, 0], sizes = [1, 256], strides = [1, 1]} : vector<9x256xf32> to vector<1x256xf32>
    %37 = vector.broadcast %36 : vector<1x256xf32> to vector<4x256xf32>
    %38 = arith.mulf %8, %37 : vector<4x256xf32>
    %cst_16 = arith.constant 0.000000e+00 : f32
    %39 = vector.broadcast %cst_16 : f32 to vector<4x1xf32>
    %40 = vector.extract_strided_slice %8 {offsets = [0, 1], sizes = [4, 255], strides = [1, 1]} : vector<4x256xf32> to vector<4x255xf32>
    %41 = tpu.concatenate %40, %39 in 1 : vector<4x255xf32>, vector<4x1xf32> -> vector<4x256xf32>
    %42 = vector.extract_strided_slice %11 {offsets = [5, 0], sizes = [1, 256], strides = [1, 1]} : vector<9x256xf32> to vector<1x256xf32>
    %43 = vector.broadcast %42 : vector<1x256xf32> to vector<4x256xf32>
    %44 = arith.mulf %41, %43 : vector<4x256xf32>
    %cst_17 = arith.constant 0.000000e+00 : f32
    %45 = vector.broadcast %cst_17 : f32 to vector<4x15xf32>
    %46 = vector.extract_strided_slice %8 {offsets = [0, 15], sizes = [4, 241], strides = [1, 1]} : vector<4x256xf32> to vector<4x241xf32>
    %47 = tpu.concatenate %46, %45 in 1 : vector<4x241xf32>, vector<4x15xf32> -> vector<4x256xf32>
    %48 = vector.extract_strided_slice %11 {offsets = [6, 0], sizes = [1, 256], strides = [1, 1]} : vector<9x256xf32> to vector<1x256xf32>
    %49 = vector.broadcast %48 : vector<1x256xf32> to vector<4x256xf32>
    %50 = arith.mulf %47, %49 : vector<4x256xf32>
    %cst_18 = arith.constant 0.000000e+00 : f32
    %51 = vector.broadcast %cst_18 : f32 to vector<4x16xf32>
    %52 = vector.extract_strided_slice %8 {offsets = [0, 16], sizes = [4, 240], strides = [1, 1]} : vector<4x256xf32> to vector<4x240xf32>
    %53 = tpu.concatenate %52, %51 in 1 : vector<4x240xf32>, vector<4x16xf32> -> vector<4x256xf32>
    %54 = vector.extract_strided_slice %11 {offsets = [7, 0], sizes = [1, 256], strides = [1, 1]} : vector<9x256xf32> to vector<1x256xf32>
    %55 = vector.broadcast %54 : vector<1x256xf32> to vector<4x256xf32>
    %56 = arith.mulf %53, %55 : vector<4x256xf32>
    %cst_19 = arith.constant 0.000000e+00 : f32
    %57 = vector.broadcast %cst_19 : f32 to vector<4x17xf32>
    %58 = vector.extract_strided_slice %8 {offsets = [0, 17], sizes = [4, 239], strides = [1, 1]} : vector<4x256xf32> to vector<4x239xf32>
    %59 = tpu.concatenate %58, %57 in 1 : vector<4x239xf32>, vector<4x17xf32> -> vector<4x256xf32>
    %60 = vector.extract_strided_slice %11 {offsets = [8, 0], sizes = [1, 256], strides = [1, 1]} : vector<9x256xf32> to vector<1x256xf32>
    %61 = vector.broadcast %60 : vector<1x256xf32> to vector<4x256xf32>
    %62 = arith.mulf %59, %61 : vector<4x256xf32>
    %63 = tpu.concatenate %17, %23, %29, %35, %38, %44, %50, %56, %62 in 0 : vector<4x256xf32>, vector<4x256xf32>, vector<4x256xf32>, vector<4x256xf32>, vector<4x256xf32>, vector<4x256xf32>, vector<4x256xf32>, vector<4x256xf32>, vector<4x256xf32> -> vector<36x256xf32>
    %64 = arith.truncf %63 : vector<36x256xf32> to vector<36x256xbf16>
    %c0_20 = arith.constant 0 : index
    %c0_21 = arith.constant 0 : index
    %65 = vector.load %arg5[%c0_20, %c0_21] : memref<4x36xbf16, #tpu.memory_space<vmem>>, vector<4x36xbf16>
    %cst_22 = arith.constant dense<0.000000e+00> : vector<4x256xf32>
    %66 = tpu.matmul %65, %64, %cst_22 {dimension_numbers = #tpu.dot_dimension_numbers<[1], [0], [0], [1], [0, 0, 1, 1], [], []>} : vector<4x36xbf16>, vector<36x256xbf16>, vector<4x256xf32> -> vector<4x256xf32>
    %c0_23 = arith.constant 0 : index
    %c0_24 = arith.constant 0 : index
    %67 = vector.load %arg6[%c0_23, %c0_24] : memref<4x1xf32, #tpu.memory_space<vmem>>, vector<4x1xf32>
    %68 = vector.broadcast %67 : vector<4x1xf32> to vector<4x256xf32>
    %69 = arith.addf %66, %68 : vector<4x256xf32>
    %70 = arith.addf %69, %10 : vector<4x256xf32>
    %cst_25 = arith.constant 0.000000e+00 : f32
    %71 = vector.broadcast %cst_25 : f32 to vector<4x256xf32>
    %72 = arith.maximumf %70, %71 : vector<4x256xf32>
    %c0_26 = arith.constant 0 : index
    %c0_27 = arith.constant 0 : index
    %c0_28 = arith.constant 0 : index
    %73 = vector.load %arg8[%c0_26, %c0_27, %c0_28] : memref<1x4x256xf32, #tpu.memory_space<vmem>>, vector<1x4x256xf32>
    %74 = vector.shape_cast %73 : vector<1x4x256xf32> to vector<4x256xf32>
    %75 = vector.shape_cast %72 : vector<4x256xf32> to vector<1x4x256xf32>
    tpu.vector_store %arg8[%c0_26, %c0_27, %c0_28], %75 {strides = array<i32>} : memref<1x4x256xf32, #tpu.memory_space<vmem>>, vector<1x4x256xf32>,
    return
  }
  func.func @transform_0(%arg0: i32) -> (i32, i32, i32) {
    %c0_i32 = arith.constant 0 : i32
    %c0_i32_0 = arith.constant 0 : i32
    %c0_i32_1 = arith.constant 0 : i32
    return %arg0, %c0_i32, %c0_i32_0 : i32, i32, i32
  }
  func.func @transform_1(%arg0: i32) -> (i32, i32) {
    %c0_i32 = arith.constant 0 : i32
    %c0_i32_0 = arith.constant 0 : i32
    %c0_i32_1 = arith.constant 0 : i32
    return %c0_i32, %c0_i32_0 : i32, i32
  }
  func.func @transform_2(%arg0: i32) -> (i32, i32) {
    %c0_i32 = arith.constant 0 : i32
    %c0_i32_0 = arith.constant 0 : i32
    %c0_i32_1 = arith.constant 0 : i32
    return %c0_i32, %c0_i32_0 : i32, i32
  }
  func.func @transform_3(%arg0: i32) -> (i32, i32, i32) {
    %c0_i32 = arith.constant 0 : i32
    %c0_i32_0 = arith.constant 0 : i32
    %c0_i32_1 = arith.constant 0 : i32
    return %arg0, %c0_i32, %c0_i32_0 : i32, i32, i32
  }
  func.func @transform_4(%arg0: i32) -> (i32, i32) {
    %c0_i32 = arith.constant 0 : i32
    %c0_i32_0 = arith.constant 0 : i32
    %c0_i32_1 = arith.constant 0 : i32
    return %c0_i32, %c0_i32_0 : i32, i32
  }
  func.func @transform_5(%arg0: i32) -> (i32, i32) {
    %c0_i32 = arith.constant 0 : i32
    %c0_i32_0 = arith.constant 0 : i32
    %c0_i32_1 = arith.constant 0 : i32
    return %c0_i32, %c0_i32_0 : i32, i32
  }
  func.func @transform_6(%arg0: i32) -> (i32, i32) {
    %c0_i32 = arith.constant 0 : i32
    %c0_i32_0 = arith.constant 0 : i32
    %c0_i32_1 = arith.constant 0 : i32
    return %c0_i32, %c0_i32_0 : i32, i32
  }
  func.func @transform_7(%arg0: i32) -> (i32, i32, i32) {
    %c0_i32 = arith.constant 0 : i32
    %c0_i32_0 = arith.constant 0 : i32
    %c0_i32_1 = arith.constant 0 : i32
    return %arg0, %c0_i32, %c0_i32_0 : i32, i32, i32
  }
}

</mosaic_0001>

<bundles_post_ra>
// kernel: tpu_custom_call.1
= control target key start
LH: loop header
LB: loop body
LE: loop exit
PB: predicated region body
PF: predicated region fallthrough
CT: control target
= control target key end

     0   :  { %12 = vsyncpa [#allocation3], 0  ;;  %s1139_s0 = inlined_call_operand.vmem [shape: bf16[2,36,256], index: 0, kind: input, shape index: {}]   ;;  %s1140_s1 = inlined_call_operand.vmem [shape: bf16[4,36], index: 1, kind: input, shape index: {}]   ;;  %s1141_s2 = inlined_call_operand.vmem [shape: f32[4,1], index: 2, kind: input, shape index: {}]   ;;  %s1142_s3 = inlined_call_operand.vmem [shape: f32[2,4,256], index: 3, kind: input, shape index: {}]   ;;  %s1143_s4 = inlined_call_operand.vmem [shape: bf16[4,36], index: 4, kind: input, shape index: {}]   ;;  %s1144_s5 = inlined_call_operand.vmem [shape: f32[4,1], index: 5, kind: input, shape index: {}]   ;;  %s1145_s6 = inlined_call_operand.vmem [shape: f32[9,256], index: 6, kind: input, shape index: {}]   ;;  %s1146_s7 = inlined_call_operand.hbm [shape: f32[2,4,256], index: 7, kind: output, shape index: {}]  }
   0x1   :  { %14 = vsyncpa [#allocation3 + $0x1], 0  ;;  %s953_s24 = smov 0   ;;  %s955_s25 = smov 0  }
   0x2   :  { %s957_s26 = smov 0   ;;  %s959_s27 = smov 0  }
   0x3 LB: > { %s974_s28 = sadd.s32 4294967295, %s901_s27   ;;  %s752_s29 = sadd.s32 4294967294, %s901_s27   ;;  %s901_s27 = sphi %s959_s27, %s1152_s27   ;;  %s897_s26 = sphi %s957_s26, %s1151_s26   ;;  %s893_s25 = sphi %s955_s25, %s1150_s25   ;;  %s889_s24 = sphi %s953_s24, %s1149_s24  }
   0x4   : > { %s978_s30 = sadd.s32 1, %s901_s27   ;;  %s184_s8 = sadd.s32 1, %s897_s26 }
   0x5   : > { %s181_s9 = ssub.s32 %s901_s27, %s978_s30  ;;  %p194_p0 = scmp.ne.s32.totalorder %s897_s26, %s893_s25 }
   0x6   : > { %p182_p1 = scmp.eq.s32.totalorder %s181_s9, 0  ;;  %p195_p2 = scmp.eq.s32.totalorder %s974_s28, 1 }
   0x7   : > { %p200_p3 = scmp.ne.s32.totalorder %s893_s25, %s889_s24  ;;  %p201_p4 = scmp.eq.s32.totalorder %s752_s29, 1 }
   0x8   : > { %s989_s10 = scalar_select %p182_p1, %s897_s26, %s184_s8  }
   0x9   : > { %p991_p5 = por %p195_p2, %p194_p0  ;;  %p995_p6 = por %p201_p4, %p200_p3 }
   0xa   : > { %p755_p7 = scmp.ge.s32.totalorder %s901_s27, 1  ;;  %p250_p8 = scmp.lt.s32.totalorder %s901_s27, 3 }
   0xc   : > { %p251_p9 = pnand %p755_p7, %p250_p8 }
   0xd   : > { %p287_p10 = scmp.lt.s32.totalorder (!%p251_p9), %s974_s28, 1  ;;  %v903_v0 = vmov (!%p251_p9), 0   ;;  %v304_v1 = vld [vmem:[%s1141_s2] sm:$0xf] (!%p251_p9)  ;;  %vm339_vm0 = vcmask (!%p251_p9), 1041408   ;;  %vm335_vm1 = vcmask (!%p251_p9), 293888   ;;  %v405_v21 = vlaneseq (!%p251_p9) }
   0xe   : > { %254 = sbr.rel (%p251_p9) target bundleno = 643 (0x283), region = 48  ;;  %378 = vmatprep.mubr.bf16.mxu0 (!%p251_p9), %v903_v0  ;;  %828 = vset.pattern.permute.xlu0 (!%p251_p9), %v903_v0  ;;  %v298_v10 = vld [vmem:[%s1140_s1] sm:$0x3] (!%p251_p9)  ;;  %s904_s22 = smov (!%p251_p9), 1   ;;  %v391_v31 = vld [vmem:[%s1145_s6 + $0x8] sm:$0xff] (!%p251_p9)  ;;  %vm457_vm2 = vcmask (!%p251_p9), 7168  }
   0xf   : > { %307 = vperm.xlu0 (!%p251_p9), %828, %v304_v1   ;;  %645 = vmatprep.mubr.bf16.mxu1 (!%p251_p9), %v903_v0  ;;  %s905_s23 = smov (!%p251_p9), 16   ;;  %s906_s29 = smov (!%p251_p9), 17   ;;  %v598_v20 = vld [vmem:[%s1144_s5] sm:$0xf] (!%p251_p9)  ;;  %v406_v24 = vshrl.u32 (!%p251_p9), %v405_v21, 7  ;;  %vm419_vm3 = vcmask (!%p251_p9), 130048  }
  0x10   : > { %829 = vset.pattern.permute.xlu1 (!%p251_p9), %v903_v0  ;;  %s907_s8 = smov (!%p251_p9), 112   ;;  %s908_s9 = smov (!%p251_p9), 15   ;;  %v390_v28 = vld [vmem:[%s1145_s6] sm:$0xff] (!%p251_p9)  ;;  %vm400_vm4 = vcmask (!%p251_p9), 138240   ;;  %vm438_vm5 = vcmask (!%p251_p9), 121856   ;;  %vm582_vm6 = vcmask (!%p251_p9), 1043456  }
  0x11   : > { %s909_s13 = smov (!%p251_p9), 127   ;;  %s910_s14 = smov (!%p251_p9), 113   ;;  %v474_v27 = vsub.s32 (!%p251_p9), 4, %v406_v24  ;;  %v464_v29 = vsub.s32 (!%p251_p9), 3, %v406_v24  ;;  %v426_v30 = vsub.s32 (!%p251_p9), 1, %v406_v24  ;;  %v407_v32 = vsub.s32 (!%p251_p9), 0, %v406_v24 }
  0x12   : > { %v445_v33 = vsub.s32 (!%p251_p9), 2, %v406_v24  ;;  %v493_v43 = vsub.s32 (!%p251_p9), 5, %v406_v24  ;;  %v531_v49 = vsub.s32 (!%p251_p9), 7, %v406_v24  ;;  %vm486_vm7 = vcmask (!%p251_p9), 1039360   ;;  %s284_s20 = sand.u32 (!%p251_p9), 1, %s893_s25  }
  0x13   : > { %v479_v36 = vrot.slane (!%p251_p9), %v391_v31, %v474_v27  ;;  %v475_v37 = vrot.slane (!%p251_p9), %v390_v28, %v474_v27  ;;  %v465_v38 = vrot.slane (!%p251_p9), %v390_v28, %v464_v29  ;;  %v427_v39 = vrot.slane (!%p251_p9), %v390_v28, %v426_v30  ;;  %s756_s21 = sshll.u32 (!%p251_p9), %s284_s20, 3 }
  0x14   : > { %v408_v41 = vrot.slane (!%p251_p9), %v390_v28, %v407_v32  ;;  %v469_v42 = vrot.slane (!%p251_p9), %v391_v31, %v464_v29  ;;  %v446_v45 = vrot.slane (!%p251_p9), %v390_v28, %v445_v33  ;;  %v412_v51 = vrot.slane (!%p251_p9), %v391_v31, %v407_v32 }
  0x15   : > { %s1006_s15 = scalar_select %p287_p10, %s974_s28, 1  ;;  %v431_v52 = vrot.slane %v391_v31, %v426_v30  ;;  %v450_v54 = vrot.slane %v391_v31, %v445_v33  ;;  %v512_v55 = vsub.s32 6, %v406_v24  ;;  %v494_v58 = vrot.slane %v390_v28, %v493_v43 }
  0x16   : > { %v498_v59 = vrot.slane %v391_v31, %v493_v43  ;;  %vm524_vm8 = vcmask 916480   ;;  %v532_v0 = vrot.slane %v390_v28, %v531_v49  ;;  %vm505_vm9 = vcmask 924672  }
  0x17   : > { %s779_s16 = smul.u32 40, %s1006_s15  ;;  %vm543_vm10 = vcmask 908288  }
  0x19   : > { %s291_s19 = scalar_lea.vmem %s1139_s0, %s779_s16  ;;  %s911_s16 = smov 111  }
  0x1a   : > { %v830_v2 = vld [vmem:[%s291_s19 + $0x4] ss:$8 sps:$4 sm:$0xff]   ;;  %v832_v3 = vld [vmem:[%s291_s19] ss:$8 sps:$4 sm:$0xff]   ;;  %v833_v4 = vld [vmem:[%s291_s19 + $0x14] ss:$8 sps:$4 sm:$0xff]  }
  0x1b   : > { %346 = vmatprep.subr.bf16.mxu0 %v830_v2  ;;  %v303_v5 = vld [vmem:[%s291_s19 + $0x20] sm:$0x33]  ;;  %v835_v6 = vld [vmem:[%s291_s19 + $0x10] ss:$8 sps:$4 sm:$0xff]  }
  0x1c   : > { %347 = vmatpush1.bf16.msra.mxu0 %v832_v3  ;;  %v765_v7 = vcombine.high %v303_v5, %v303_v5  ;;  %v764_v8 = vcombine.low %v303_v5, %v303_v5 }
  0x1d   : > { %348 = vmatprep.subr.bf16.mxu0 %v833_v4  ;;  %v536_v4 = vrot.slane %v391_v31, %v531_v49 }
  0x1e   : > { %v341_v9 = vsel %vm339_vm0, %v764_v8, 0 }
  0x20   : > { %349 = vmatpush1.bf16.msra.mxu0 %v835_v6 }
  0x21   : > { %766 = vmatprep.subr.msk.bf16.mxu0 %vm339_vm0, %v765_v7  ;;  %v517_v7 = vrot.slane %v391_v31, %v512_v55 }
  0x24   : > { %351 = vmatpush1.bf16.msra.mxu0 %v341_v9 }
  0x27   : > { %767 = vmatmul.mubr.msk.bf16.vlgmr.msra.gmra.mrb[0].mxu0 %vm335_vm1, %v298_v10 }
  0x8e   : > { %v308_v11 = vpop.permute.xlu0 %307 }
  0xfa   : > { %v380_v12 = vpop.f32.mrb[0].mxu0 }
  0xfb   : > { %v381_v13 = vadd.f32 %v380_v12, %v308_v11  ;;  %v382_v14 = vpop.f32.mrb[1].mxu0 }
  0xfc   : > { %v384_v15 = vpop.f32.mrb[2].mxu0  ;;  %v383_v18 = vadd.f32 %v382_v14, %v308_v11  ;;  %v513_v11 = vrot.slane %v390_v28, %v512_v55 }
  0xfd   : > { %v1018_v16 = vmax.f32 %v381_v13, 0.0  ;;  %v385_v17 = vpop.f32.mrb[3].mxu0 }
  0xfe   : > { %v1024_v19 = vmax.f32 %v383_v18, 0.0 }
  0xff   : > { %453 = vrot.lane.b32.xlu1 %v1018_v16, %s904_s22  ;;  %415 = vrot.lane.b32.xlu0 %v1018_v16, %s905_s23  ;;  %v480_v31 = vmul.f32 %v475_v37, %v1018_v16 }
 0x100   : > { %v481_v30 = vmul.f32 %v479_v36, %v1024_v19  ;;  %v769_v36 = vld [vmem:[%s1145_s6 + $0x18] ss:$0 sm:$0xff] }
 0x103   : > { %396 = vrot.lane.b32.xlu1 %v1018_v16, %s906_s29  ;;  %520 = vrot.lane.b32.xlu0 %v1018_v16, %s907_s8 }
 0x107   : > { %434 = vrot.lane.b32.xlu1 %v1018_v16, %s908_s9  ;;  %455 = vrot.lane.b32.xlu0 %v1024_v19, %s904_s22  ;;  %s286_s22 = scalar_lea.vmem [#allocation2], %s756_s21 }
 0x10b   : > { %482 = vrot.lane.b32.xlu1 %v1018_v16, %s909_s13  ;;  %398 = vrot.lane.b32.xlu0 %v1024_v19, %s906_s29 }
 0x10f   : > { %417 = vrot.lane.b32.xlu1 %v1024_v19, %s905_s23  ;;  %436 = vrot.lane.b32.xlu0 %v1024_v19, %s908_s9  ;;  %s681_s23 = sshll.u32 %s286_s22, 4  ;;  %s1099_s23 = int_to_ptr.vmem [resolvable:$true] %s681_s23 }
 0x113   : > { %484 = vrot.lane.b32.xlu1 %v1024_v19, %s909_s13  ;;  %522 = vrot.lane.b32.xlu0 %v1024_v19, %s907_s8  ;;  %s667_s13 = scalar_lea.sflag [#allocation3], %s284_s20 }
 0x117   : > { %503 = vrot.lane.b32.xlu1 %v1024_v19, %s910_s14  ;;  %501 = vrot.lane.b32.xlu0 %v1018_v16, %s910_s14  ;;  %s839_s14 = scalar_lea.vmem %s1099_s23, 128 }
 0x118   : > { %p840_p11 = scmp.ne.s32.totalorder %s1099_s23, %s839_s14 }
 0x11a   : > { %p841_p12 = pnand %p840_p11, %p991_p5 }
 0x11b   : > { %539 = vrot.lane.b32.xlu1 %v1018_v16, %s911_s16  ;;  %541 = vrot.lane.b32.xlu0 %v1024_v19, %s911_s16  ;;  %v768_v16 = vld [vmem:[%s1145_s6 + $0x10] ss:$0 sm:$0xff]  ;;  %s777_s16 = sshll.u32 %s1006_s15, 3  ;;  %s778_s15 = sshll.u32 %s974_s28, 7 }
 0x11c   : > { %s296_s19 = scalar_lea.vmem %s1142_s3, %s777_s16  ;;  %s1097_s9 = scalar_lea.hbm %s1146_s7, %s778_s15 }
 0x11d   : > { %p842_p13 = pneg %p841_p12  ;;  %s912_s28 = smov [#allocation2]  }
 0x11e   : > { %s843_s16 = sshll.u32 %s912_s28, 4  ;;  %s844_s16 = int_to_ptr.vmem [resolvable:$false] %s843_s16 }
 0x11f   : > { %601 = vperm.xlu1 %829, %v598_v20   ;;  %s845_s17 = scalar_lea.vmem %s844_s16, 256  ;;  %p846_p0 = scmp.lt.s32.totalorder %s1099_s23, %s844_s16 }
 0x120   : > { %p847_p1 = scmp.lt.s32.totalorder %s845_s17, %s839_s14 }
 0x122   : > { %p848_p2 = por %p847_p1, %p846_p0 }
 0x124   : > { %p849_p3 = pnand %p848_p2, %p842_p13 }
 0x171   : > { %v454_v22 = vpop.permute.xlu1 %453  ;;  %v416_v23 = vpop.permute.xlu0 %415 }
 0x172   : > { %v461_v40 = vsel %vm457_vm2, 0.0, %v454_v22  ;;  %v423_v44 = vsel %vm419_vm3, 0.0, %v416_v23 }
 0x173   : > { %v470_v53 = vmul.f32 %v465_v38, %v461_v40  ;;  %v432_v56 = vmul.f32 %v427_v39, %v423_v44 }
 0x175   : > { %v397_v25 = vpop.permute.xlu1 %396  ;;  %v1041_v26 = vpop.permute.xlu0 %520  ;;  %v566_v5 = vrot.slane %v470_v53, 4  ;;  %v560_v8 = vrot.slane %v432_v56, 4 }
 0x176   : > { %v404_v60 = vsel %vm400_vm4, 0.0, %v397_v25 }
 0x177   : > { %v413_v9 = vmul.f32 %v408_v41, %v404_v60  ;;  %v597_v60 = vld [vmem:[%s1143_s4] sm:$0x3] }
 0x179   : > { %v435_v34 = vpop.permute.xlu1 %434  ;;  %v456_v35 = vpop.permute.xlu0 %455 }
 0x17a   : > { %v458_v46 = vsel %vm457_vm2, %v454_v22, %v456_v35  ;;  %v442_v50 = vsel %vm438_vm5, 0.0, %v435_v34 }
 0x17b   : > { %v471_v57 = vmul.f32 %v469_v42, %v458_v46  ;;  %v451_v61 = vmul.f32 %v446_v45, %v442_v50 }
 0x17d   : > { %v483_v47 = vpop.permute.xlu1 %482  ;;  %v399_v48 = vpop.permute.xlu0 %398  ;;  %v567_v10 = vrot.slane %v471_v57, 4  ;;  %v585_v18 = vsel %vm582_vm6, %v451_v61, %v566_v5  ;;  %v389_v61 = vld [vmem:[%s296_s19] sm:$0xff] }
 0x17e   : > { %v401_v1 = vsel %vm400_vm4, %v397_v25, %v399_v48 }
 0x17f   : > { %v414_v12 = vmul.f32 %v412_v51, %v401_v1 }
 0x181   : > { %v418_v62 = vpop.permute.xlu1 %417  ;;  %v437_v63 = vpop.permute.xlu0 %436 }
 0x182   : > { %v420_v2 = vsel %vm419_vm3, %v416_v23, %v418_v62  ;;  %v439_v3 = vsel %vm438_vm5, %v435_v34, %v437_v63 }
 0x183   : > { %v433_v6 = vmul.f32 %v431_v52, %v420_v2  ;;  %v452_v14 = vmul.f32 %v450_v54, %v439_v3 }
 0x185   : > { %v561_v13 = vrot.slane %v433_v6, 4  ;;  %v485_v15 = vpop.permute.xlu1 %484  ;;  %v523_v17 = vpop.permute.xlu0 %522  ;;  %v586_v38 = vsel %vm582_vm6, %v452_v14, %v567_v10 }
 0x186   : > { %v487_v20 = vsel %vm486_vm7, %v483_v47, %v485_v15  ;;  %v490_v21 = vsel %vm486_vm7, %v485_v15, 0.0  ;;  %v525_v22 = vsel %vm524_vm8, %v1041_v26, %v523_v17  ;;  %v528_v23 = vsel %vm524_vm8, %v523_v17, 0.0 }
 0x187   : > { %v499_v24 = vmul.f32 %v494_v58, %v487_v20  ;;  %v500_v25 = vmul.f32 %v498_v59, %v490_v21  ;;  %v537_v27 = vmul.f32 %v532_v0, %v525_v22  ;;  %v538_v28 = vmul.f32 %v536_v4, %v528_v23 }
 0x188   : > { %v584_v29 = vsel %vm582_vm6, %v414_v12, %v561_v13  ;;  %v583_v26 = vsel %vm582_vm6, %v413_v9, %v560_v8  ;;  %v655_v0 = vcombine.high %v389_v61, %v389_v61 }
 0x189   : > { %v572_v32 = vrot.slane %v499_v24, 4  ;;  %v573_v33 = vrot.slane %v500_v25, 4  ;;  %v504_v34 = vpop.permute.xlu1 %503  ;;  %v502_v35 = vpop.permute.xlu0 %501  ;;  %v592_v41 = vpack.c.bf16 %v586_v38, %v584_v29  ;;  %v591_v42 = vpack.c.bf16 %v585_v18, %v583_v26 }
 0x18a   : > { %v509_v39 = vsel %vm505_vm9, %v504_v34, 0.0  ;;  %v506_v40 = vsel %vm505_vm9, %v502_v35, %v504_v34  ;;  %v578_v43 = vrot.slane %v537_v27, 4  ;;  %v579_v44 = vrot.slane %v538_v28, 4 }
 0x18b   : > { %v519_v45 = vmul.f32 %v517_v7, %v509_v39  ;;  %v518_v19 = vmul.f32 %v513_v11, %v506_v40  ;;  %613 = vmatprep.subr.bf16.mxu1 %v592_v41  ;;  %v588_v47 = vsel %vm582_vm6, %v481_v30, %v573_v33  ;;  %v587_v49 = vsel %vm582_vm6, %v480_v31, %v572_v32 }
 0x18c   : > { %614 = vmatpush1.bf16.msra.mxu1 %v591_v42 }
 0x18d   : > { %v540_v37 = vpop.permute.xlu1 %539  ;;  %v542_v46 = vpop.permute.xlu0 %541  ;;  %v590_v48 = vsel %vm582_vm6, %v519_v45, %v579_v44  ;;  %v589_v50 = vsel %vm582_vm6, %v518_v19, %v578_v43 }
 0x18e   : > { %v544_v51 = vsel %vm543_vm10, %v540_v37, %v542_v46  ;;  %v547_v52 = vsel %vm543_vm10, %v542_v46, 0.0  ;;  %v594_v53 = vpack.c.bf16 %v590_v48, %v588_v47  ;;  %v593_v54 = vpack.c.bf16 %v589_v50, %v587_v49 }
 0x18f   : > { %v556_v55 = vmul.f32 %v768_v16, %v544_v51  ;;  %v557_v56 = vmul.f32 %v769_v36, %v547_v52 }
 0x190   : > { %615 = vmatprep.subr.bf16.mxu1 %v594_v53 }
 0x191   : > { %v595_v57 = vpack.c.bf16 %v556_v55, %v556_v55  ;;  %v596_v58 = vpack.c.bf16 %v557_v56, %v557_v56  ;;  %616 = vmatpush1.bf16.msra.mxu1 %v593_v54 }
 0x193   : > { %770 = vmatprep.subr.msk.bf16.mxu1 %vm339_vm0, %v596_v58  ;;  %v608_v59 = vsel %vm339_vm0, %v595_v57, 0 }
 0x195   : > { %618 = vmatpush1.bf16.msra.mxu1 %v608_v59 }
 0x198   : > { %771 = vmatmul.mubr.msk.bf16.vlgmr.msra.gmra.mrb[0].mxu1 %vm335_vm1, %v597_v60 }
 0x19e   : > { %v602_v62 = vpop.permute.xlu1 %601 }
 0x26b   : > { %v647_v63 = vpop.f32.mrb[0].mxu1 }
 0x26c   : > { %v648_v1 = vadd.f32 %v647_v63, %v602_v62  ;;  %v649_v2 = vpop.f32.mrb[1].mxu1 }
 0x26d   : > { %v650_v3 = vadd.f32 %v649_v2, %v602_v62  ;;  %v651_v4 = vpop.f32.mrb[2].mxu1 }
 0x26e   : > { %v657_v5 = vadd.f32 %v648_v1, %v389_v61  ;;  %v652_v6 = vpop.f32.mrb[3].mxu1 }
 0x26f   : > { %v658_v7 = vadd.f32 %v655_v0, %v650_v3 }
 0x270   : > { %v659_v8 = vmax.f32 %v657_v5, 0.0 }
 0x271   : > { %v660_v9 = vmax.f32 %v658_v7, 0.0 }
 0x273   : > { %v663_v10 = vcombine.low %v659_v8, %v660_v9 }
 0x275   : > { %665 = vst [vmem:[%s286_s22] sm:$0xff] %v663_v10 }
 0x276   : > { %852 = shalt.err (!%p849_p3)
}
 0x277   : > { %s853_s18 = scalar_lea.hbm %s1097_s9, 128  ;;  %s857_s21 = scalar_lea.hbm %s1146_s7, 256 }
 0x278   : > { %p854_p4 = scmp.ne.s32.totalorder %s1097_s9, %s853_s18  ;;  %p858_p9 = scmp.lt.u32.totalorder %s1097_s9, %s1146_s7 }
 0x279   : > { %p859_p10 = scmp.lt.u32.totalorder %s857_s21, %s853_s18  ;;  %p861_p12 = scmp.lt.u32.totalorder %s853_s18, %s1097_s9 }
 0x27a   : > { %p855_p7 = pnand %p854_p4, %p991_p5 }
 0x27b   : > { %p860_p11 = por %p859_p10, %p858_p9 }
 0x27c   : > { %p856_p8 = pneg %p855_p7 }
 0x27d   : > { %p862_p13 = por %p861_p12, %p860_p11 }
 0x27f   : > { %p863_p0 = pnand %p862_p13, %p856_p8 }
 0x281   : > { %866 = shalt.err (!%p863_p0)
}
 0x282   : > { %780 = dma.vmem_to_hbm [thread:$0]  (%p991_p5), %s1099_s23, 128, %s1097_s9, %s667_s13  }
 0x283 PF: > { %p786_p1 = scmp.ge.s32.totalorder %s901_s27, 2  ;;  %s693_s29 = sand.u32 1, %s889_s24  }
 0x284   : > { %s694_s8 = scalar_lea.sflag [#allocation3], %s693_s29 }
 0x285   : > { %p783_p2 = pnand %p786_p1, %p995_p6 }
 0x287   : > { %884 = dma.done.wait (!%p783_p2), %s694_s8, 128  }
 0x288   : > { %886 = vsyncadd (!%p783_p2), %s694_s8, 4294967168  ;;  %p17_p3 = scmp.ge.s32.totalorder %s978_s30, 4   ;;  %s1149_s24 = smov %s893_s25 }
 0x289   : > { %s1150_s25 = smov %s897_s26  ;;  %s1151_s26 = smov %s989_s10 }
 0x28a   : > { %s1152_s27 = smov %s978_s30  ;;  %19 = sbr.rel (!%p17_p3) target bundleno = 3 (0x3), region = 86 }
 0x291   :  { %699 = vsyncpa [#allocation3], 1 }
 0x292   :  { %701 = vsyncpa [#allocation3 + $0x1], 1 }

</bundles_post_ra>
